<compile_context>
chip_gen: v7x
topology: tpu7x:2x2x1
jax: 0.10.0
libtpu: 0.0.40
codegen_flags: <defaults>
</compile_context>

<pallas_src>
import functools

import jax
import jax.numpy as jnp
from jax import lax
from jax.experimental import pallas as pl
from jax.experimental.pallas import tpu as pltpu  # noqa: F401  (kept for TPU-specific tuning hooks)

block_size = 8   # max T
n_embd = 32      # C
head_size = 16   # H (d_k / d_v)


def head_kernel(x_ref, wqkv_ref, o_ref, *, B, T, H):
    """x_ref: (B*T, C) flattened batch; wqkv_ref: (C, 3H) fused [Wk|Wq|Wv]."""
    x = x_ref[...].astype(jnp.float32)                        # (B*T, C)
    C = x.shape[-1]

    # One fused MXU push for all three projections: (B*T, C) @ (C, 3H).
    qkv = jnp.dot(x, wqkv_ref[...].astype(jnp.float32),
                  preferred_element_type=jnp.float32)          # (B*T, 3H)

    k = qkv[:, 0 * H:1 * H].reshape(B, T, H)
    q = qkv[:, 1 * H:2 * H].reshape(B, T, H)
    v = qkv[:, 2 * H:3 * H].reshape(B, T, H)

    scale = jnp.float32(C) ** jnp.float32(-0.5)                # C ** -0.5 (as in reference)

    # Batched q @ k^T without materializing a transpose: contract H, batch B.
    wei = lax.dot_general(
        q, k,
        dimension_numbers=(((2,), (2,)), ((0,), (0,))),
        preferred_element_type=jnp.float32) * scale            # (B, T, T)

    # Causal-mask line in the reference is a no-op -> intentionally no mask.
    # TODO(synk): if downstream actually wants causal attention, add the
    #             tril mask here (the PyTorch module discards it).

    # Numerically-stable softmax along the last axis.
    wei = wei - jnp.max(wei, axis=-1, keepdims=True)
    wei = jnp.exp(wei)
    denom = jnp.sum(wei, axis=-1, keepdims=True)
    wei = wei * pl.reciprocal(denom, approx=True)              # EUP, frees VALU slots

    # wei @ v, batched over B.
    out = lax.dot_general(
        wei, v.astype(jnp.float32),
        dimension_numbers=(((2,), (1,)), ((0,), (0,))),
        preferred_element_type=jnp.float32)                    # (B, T, H)

    o_ref[...] = out.reshape(B * T, H).astype(o_ref.dtype)


def head_forward(x, wk, wq, wv):
    """x: (B, T, C); wk/wq/wv: (C, H).  Returns (B, T, H)."""
    B, T, C = x.shape
    H = wk.shape[1]

    # Wrapper-side layout plumbing (free in XLA): flatten batch, fuse weights.
    x_flat = x.reshape(B * T, C)
    w_qkv = jnp.concatenate([wk, wq, wv], axis=1)              # (C, 3H)

    out_flat = pl.pallas_call(
        functools.partial(head_kernel, B=B, T=T, H=H),
        out_shape=jax.ShapeDtypeStruct((B * T, H), x.dtype),
        # No grid: single invocation, whole arrays resident in VMEM.
        in_specs=[
            pl.BlockSpec((B * T, C), lambda: (0, 0)),
            pl.BlockSpec((C, 3 * H), lambda: (0, 0)),
        ],
        out_specs=pl.BlockSpec((B * T, H), lambda: (0, 0)),
    )(x_flat, w_qkv)

    return out_flat.reshape(B, T, H)


def head_reference(x, wk, wq, wv):
    """Pure-JAX reference mirroring the (buggy-mask) PyTorch forward."""
    B, T, C = x.shape
    k = x @ wk
    q = x @ wq
    v = x @ wv
    wei = (q @ jnp.swapaxes(k, -2, -1)) * (C ** -0.5)
    wei = jax.nn.softmax(wei, axis=-1)
    return wei @ v


if __name__ == "__main__":
    key = jax.random.PRNGKey(0)
    kx, kk, kq, kv = jax.random.split(key, 4)

    B, T, C, H = 2, block_size, n_embd, head_size

    x = jax.random.normal(kx, (B, T, C), dtype=jnp.float32)
    # deterministic "PyTorch Linear"-style weights, stored pre-transposed (C, H)
    wk = jax.random.normal(kk, (C, H), dtype=jnp.float32) * (C ** -0.5)
    wq = jax.random.normal(kq, (C, H), dtype=jnp.float32) * (C ** -0.5)
    wv = jax.random.normal(kv, (C, H), dtype=jnp.float32) * (C ** -0.5)

    out = head_forward(x, wk, wq, wv)
    out = jax.block_until_ready(out)

    ref = head_reference(x, wk, wq, wv)
    assert out.shape == (B, T, H)
    # Tolerance relaxed slightly because the softmax denominator uses the
    # EUP approximate reciprocal (pl.reciprocal(approx=True)).
    assert jnp.allclose(out, ref, atol=1e-2, rtol=1e-2), "mismatch vs reference"

    print("KERNEL_OK")
</pallas_src>

<mosaic_0001>
module attributes {stable_mosaic.version = 11 : i64} {
  func.func @head_kernel(%arg0: memref<16x32xf32, #tpu.memory_space<vmem>>, %arg1: memref<32x48xf32, #tpu.memory_space<vmem>>, %arg2: memref<16x16xf32, #tpu.memory_space<vmem>>) attributes {dimension_semantics = [], scalar_prefetch = 0 : i64, scratch_operands = 0 : i64, tpu.core_type = #tpu.core_type<tc>} {
    %c0 = arith.constant 0 : index
    %c0_0 = arith.constant 0 : index
    %0 = vector.load %arg0[%c0, %c0_0] : memref<16x32xf32, #tpu.memory_space<vmem>>, vector<16x32xf32>
    %c0_1 = arith.constant 0 : index
    %c0_2 = arith.constant 0 : index
    %1 = vector.load %arg1[%c0_1, %c0_2] : memref<32x48xf32, #tpu.memory_space<vmem>>, vector<32x48xf32>
    %cst = arith.constant dense<0.000000e+00> : vector<16x48xf32>
    %2 = tpu.matmul %0, %1, %cst {dimension_numbers = #tpu.dot_dimension_numbers<[1], [0], [0], [1], [0, 0, 1, 1], [], []>} : vector<16x32xf32>, vector<32x48xf32>, vector<16x48xf32> -> vector<16x48xf32>
    %3 = vector.extract_strided_slice %2 {offsets = [0, 0], sizes = [16, 16], strides = [1, 1]} : vector<16x48xf32> to vector<16x16xf32>
    %4 = vector.shape_cast %3 : vector<16x16xf32> to vector<2x8x16xf32>
    %5 = vector.extract_strided_slice %2 {offsets = [0, 16], sizes = [16, 16], strides = [1, 1]} : vector<16x48xf32> to vector<16x16xf32>
    %6 = vector.shape_cast %5 : vector<16x16xf32> to vector<2x8x16xf32>
    %7 = vector.extract_strided_slice %2 {offsets = [0, 32], sizes = [16, 16], strides = [1, 1]} : vector<16x48xf32> to vector<16x16xf32>
    %8 = vector.shape_cast %7 : vector<16x16xf32> to vector<2x8x16xf32>
    %cst_3 = arith.constant 3.200000e+01 : f32
    %cst_4 = arith.constant -5.000000e-01 : f32
    %9 = math.powf %cst_3, %cst_4 : f32
    %cst_5 = arith.constant dense<0.000000e+00> : vector<2x8x8xf32>
    %10 = tpu.matmul %6, %4, %cst_5 {dimension_numbers = #tpu.dot_dimension_numbers<[2], [2], [1], [1], [0, 0, 0, 1, 1, 1], [0], [0]>} : vector<2x8x16xf32>, vector<2x8x16xf32>, vector<2x8x8xf32> -> vector<2x8x8xf32>
    %11 = vector.broadcast %9 : f32 to vector<2x8x8xf32>
    %12 = arith.mulf %10, %11 : vector<2x8x8xf32>
    %cst_6 = arith.constant dense<0xFF800000> : vector<2x8xf32>
    %13 = vector.multi_reduction <maximumf>, %12, %cst_6 [2] : vector<2x8x8xf32> to vector<2x8xf32>
    %14 = vector.shape_cast %13 : vector<2x8xf32> to vector<2x8x1xf32>
    %15 = vector.broadcast %14 : vector<2x8x1xf32> to vector<2x8x8xf32>
    %16 = arith.subf %12, %15 : vector<2x8x8xf32>
    %17 = math.exp %16 : vector<2x8x8xf32>
    %cst_7 = arith.constant dense<0.000000e+00> : vector<2x8xf32>
    %18 = vector.multi_reduction <add>, %17, %cst_7 [2] : vector<2x8x8xf32> to vector<2x8xf32>
    %19 = vector.shape_cast %18 : vector<2x8xf32> to vector<2x8x1xf32>
    %20 = tpu.reciprocal %19 {approx = true} : vector<2x8x1xf32> -> vector<2x8x1xf32>
    %21 = vector.broadcast %20 : vector<2x8x1xf32> to vector<2x8x8xf32>
    %22 = arith.mulf %17, %21 : vector<2x8x8xf32>
    %cst_8 = arith.constant dense<0.000000e+00> : vector<2x8x16xf32>
    %23 = tpu.matmul %22, %8, %cst_8 {dimension_numbers = #tpu.dot_dimension_numbers<[2], [1], [1], [2], [0, 0, 0, 1, 1, 2], [0], [0]>} : vector<2x8x8xf32>, vector<2x8x16xf32>, vector<2x8x16xf32> -> vector<2x8x16xf32>
    %24 = vector.shape_cast %23 : vector<2x8x16xf32> to vector<16x16xf32>
    %c0_9 = arith.constant 0 : index
    %c0_10 = arith.constant 0 : index
    %25 = vector.load %arg2[%c0_9, %c0_10] : memref<16x16xf32, #tpu.memory_space<vmem>>, vector<16x16xf32>
    tpu.vector_store %arg2[%c0_9, %c0_10], %24 {strides = array<i32>} : memref<16x16xf32, #tpu.memory_space<vmem>>, vector<16x16xf32>,
    return
  }
}

</mosaic_0001>

<bundles_post_ra>
// kernel: tpu_custom_call.1
= control target key start
LH: loop header
LB: loop body
LE: loop exit
PB: predicated region body
PF: predicated region fallthrough
CT: control target
= control target key end

     0   :  { %7 = vsyncpa [#allocation3], 0  ;;  %s715_s0 = inlined_call_operand.hbm [shape: f32[16,32], index: 0, kind: input, shape index: {}]   ;;  %s716_s1 = inlined_call_operand.hbm [shape: f32[32,48], index: 1, kind: input, shape index: {}]   ;;  %s717_s2 = inlined_call_operand.hbm [shape: f32[16,16], index: 2, kind: output, shape index: {}]  }
   0x1   :  { %8 = vsyncpa [#allocation6], 0 }
   0x2   :  { %9 = vsyncpa [#allocation4], 0  ;;  %s630_s9 = smov [#allocation2]   ;;  %s558_s13 = scalar_lea.hbm %s715_s0, 256 }
   0x3   :  { %s15_s10 = sshll.u32 %s630_s9, 4  ;;  %p559_p0 = scmp.ne.s32.totalorder %s715_s0, %s558_s13  ;;  %s16_s10 = int_to_ptr.vmem [resolvable:$true] %s15_s10 }
   0x4   :  { %p562_p1 = scmp.lt.u32.totalorder %s558_s13, %s715_s0 }
   0x6   :  { %p564_p2 = pnand %p562_p1, %p559_p0 }
   0x8   :  { %567 = shalt.err (!%p564_p2)
}
   0x9   :  { %s568_s18 = scalar_lea.vmem %s16_s10, 256  ;;  %p573_p4 = scmp.lt.s32.totalorder %s16_s10, %s16_s10 }
   0xa   :  { %p569_p3 = scmp.ne.s32.totalorder %s16_s10, %s568_s18  ;;  %p574_p5 = scmp.lt.s32.totalorder %s568_s18, %s568_s18 }
   0xc   :  { %p575_p6 = por %p574_p5, %p573_p4 }
   0xe   :  { %p576_p7 = pnand %p575_p6, %p569_p3 }
  0x10   :  { %579 = shalt.err (!%p576_p7)
}
  0x11   :  { %s631_s19 = smov 128   ;;  %s632_s20 = smov 8  }
  0x12   :  { %21 = dma.hbm_to_vmem [thread:$0]  %s715_s0, 256, %s16_s10, [#allocation3], %s631_s19, %s631_s19, %s632_s20  }
  0x13   :  { %s633_s23 = smov [#allocation5]   ;;  %s580_s27 = scalar_lea.hbm %s716_s1, 512 }
  0x14   :  { %s27_s24 = sshll.u32 %s633_s23, 4  ;;  %p581_p8 = scmp.ne.s32.totalorder %s716_s1, %s580_s27  ;;  %s28_s24 = int_to_ptr.vmem [resolvable:$true] %s27_s24 }
  0x15   :  { %p584_p9 = scmp.lt.u32.totalorder %s580_s27, %s716_s1 }
  0x17   :  { %p586_p10 = pnand %p584_p9, %p581_p8 }
  0x19   :  { %589 = shalt.err (!%p586_p10)
}
  0x1a   :  { %s590_s4 = scalar_lea.vmem %s28_s24, 512  ;;  %p595_p12 = scmp.lt.s32.totalorder %s28_s24, %s28_s24 }
  0x1b   :  { %p591_p11 = scmp.ne.s32.totalorder %s28_s24, %s590_s4  ;;  %p596_p13 = scmp.lt.s32.totalorder %s590_s4, %s590_s4 }
  0x1d   :  { %p597_p0 = por %p596_p13, %p595_p12 }
  0x1f   :  { %p598_p1 = pnand %p597_p0, %p591_p11 }
  0x21   :  { %601 = shalt.err (!%p598_p1)
}
  0x22   :  { %33 = dma.hbm_to_vmem [thread:$0]  %s716_s1, 512, %s28_s24, [#allocation6], %s631_s19, %s631_s19, %s632_s20  }
  0x23   :  { %624 = dma.done.wait [#allocation3], 256  }
  0x24   :  { %625 = vsyncadd [#allocation3], 4294967040 }
  0x25   :  { %626 = dma.done.wait [#allocation6], 512  }
  0x26   :  { %627 = vsyncadd [#allocation6], 4294966784  ;;  %vm46_vm0 = vcmask 261120   ;;  %v42_v0 = vld [vmem:[#allocation5] sm:$0xff]  ;;  %v43_v1 = vld [vmem:[#allocation5 + $0x8] sm:$0xff]  ;;  %v634_v8 = vmov 0.0  }
  0x27   :  { %v44_v2 = vld [vmem:[#allocation5 + $0x10] sm:$0xff]  ;;  %v533_v3 = vpack.c.bf16 %v43_v1, %v42_v0  ;;  %v45_v4 = vld [vmem:[#allocation5 + $0x18] sm:$0xff]  ;;  %513 = vmatprep.subr.mxu1 %v634_v8  ;;  %vm635_vm1 = vmmov 0   ;;  %vm131_vm2 = vcmask 130048   ;;  %s636_s1 = smov 112   ;;  %vm285_vm3 = vcmask 64512  }
  0x28   :  { %v40_v5 = vld [vmem:[#allocation2] sm:$0xff]  ;;  %v537_v6 = vpack.c.bf16 %v45_v4, %v44_v2  ;;  %v41_v7 = vld [vmem:[#allocation2 + $0x8] sm:$0xff]  ;;  %515 = vmatprep.mubr.msk.f32.mxu1 %vm635_vm1, %v634_v8  ;;  %s637_s6 = smov 96   ;;  %s638_s7 = smov [#allocation7]  }
  0x29   :  { %510 = vmatprep.mubr.msk.f32.mxu0 %vm46_vm0, %v40_v5  ;;  %534 = vmatprep.subr.bf16.mxu0 %v533_v3  ;;  %s467_s8 = sshll.u32 %s638_s7, 4  ;;  %s468_s8 = int_to_ptr.vmem [resolvable:$true] %s467_s8 }
  0x2a   :  { %536 = vmatpush3.bf16.msra.mxu0 %v533_v3  ;;  %s602_s9 = scalar_lea.vmem %s468_s8, 256  ;;  %p607_p3 = scmp.lt.s32.totalorder %s468_s8, %s468_s8 }
  0x2b   :  { %538 = vmatprep.subr.bf16.mxu0 %v537_v6  ;;  %p603_p2 = scmp.ne.s32.totalorder %s468_s8, %s602_s9  ;;  %p608_p4 = scmp.lt.s32.totalorder %s602_s9, %s602_s9 }
  0x2d   :  { %p609_p5 = por %p608_p4, %p607_p3 }
  0x2e   :  { %540 = vmatpush3.bf16.msra.mxu0 %v537_v6 }
  0x2f   :  { %523 = vmatprep.subr.mxu0 %v634_v8  ;;  %p610_p6 = pnand %p609_p5, %p603_p2 }
  0x31   :  { %511 = vmatmul.mubr.msk.f32.vlgmr.msra.gmra.mrb[0].mxu0 %vm46_vm0, %v41_v7 }
  0x32   :  { %525 = vmatprep.mubr.msk.f32.mxu0 %vm635_vm1, %v634_v8 }
 0x104   :  { %v512_v9 = vpop.f32.mrb[0].mxu0 }
 0x105   :  { %v119_v10 = vpop.f32.mrb[1].mxu0 }
 0x106   :  { %129 = vrot.lane.b32.xlu0 %v119_v10, %s636_s1  ;;  %514 = vmatpush3.xpose.msk.msra.mxu1 %vm131_vm2, %v119_v10 }
 0x107   :  { %518 = vmatprep.subr.mxu1 %v634_v8 }
 0x10a   :  { %207 = vrot.lane.b32.xlu0 %v512_v9, %s636_s1 }
 0x178   :  { %v130_v11 = vpop.permute.xlu0 %129 }
 0x179   :  { %516 = vmatmul.mubr.msk.f32.vlgmr.msra.gmra.mrb[0].mxu1 %vm131_vm2, %v130_v11 }
 0x17a   :  { %519 = vmatpush3.xpose.msk.msra.mxu1 %vm131_vm2, %v512_v9  ;;  %520 = vmatprep.mubr.msk.f32.mxu1 %vm635_vm1, %v634_v8 }
 0x17b   :  { %528 = vmatprep.subr.mxu1 %v634_v8 }
 0x17c   :  { %v208_v12 = vpop.permute.xlu0 %207 }
 0x17d   :  { %521 = vmatmul.mubr.msk.f32.vlgmr.msra.gmra.mrb[2].mxu1 %vm131_vm2, %v208_v12 }
 0x17e   :  { %530 = vmatprep.mubr.msk.f32.mxu1 %vm635_vm1, %v634_v8 }
 0x24c   :  { %v202_v13 = vpop.f32.mrb[0].mxu1 }
 0x24d   :  { %v283_v14 = vmul.f32 0.17677669, %v202_v13  ;;  %v517_v15 = vpop.f32.mrb[1].mxu1 }
 0x24f   :  { %v286_v16 = vsel %vm285_vm3, %v283_v14, -inf }
 0x250   :  { %287 = vmax.xlane.f32.xlu1 %v286_v16  ;;  %v279_v17 = vpop.f32.mrb[2].mxu1 }
 0x251   :  { %v284_v18 = vmul.f32 0.17677669, %v279_v17  ;;  %v522_v19 = vpop.f32.mrb[3].mxu1 }
 0x253   :  { %v289_v20 = vsel %vm285_vm3, %v284_v18, -inf }
 0x254   :  { %290 = vmax.xlane.f32.xlu1 %v289_v20 }
 0x265   :  { %308 = vrot.lane.b32.xlu1 %v119_v10, %s637_s6 }
 0x2dd   :  { %v288_v21 = vpop.xlane.xlu1 %287 }
 0x2de   :  { %v292_v22 = vsub.f32 %v283_v14, %v288_v21 }
 0x2e0   :  { %v294_v23 = vmul.f32 1.442695, %v292_v22 }
 0x2e1   :  { %v291_v24 = vpop.xlane.xlu1 %290 }
 0x2e2   :  { %550 = vpow2.f32 %v294_v23  ;;  %v293_v25 = vsub.f32 %v284_v18, %v291_v24 }
 0x2e4   :  { %v296_v26 = vmul.f32 1.442695, %v293_v25 }
 0x2e5   :  { %v309_v27 = vpop.permute.xlu1 %308 }
 0x2e6   :  { %552 = vpow2.f32 %v296_v26  ;;  %524 = vmatpush3.msra.mxu0 %v309_v27 }
 0x2ec   :  { %v551_v28 = vpop.eup %550 }
 0x2ed   :  { %v298_v29 = vsel %vm285_vm3, %v551_v28, 0.0 }
 0x2ee   :  { %299 = vadd.xlane.f32.xlu0 %v298_v29 }
 0x2f0   :  { %v553_v30 = vpop.eup %552 }
 0x2f1   :  { %v301_v31 = vsel %vm285_vm3, %v553_v30, 0.0 }
 0x2f2   :  { %302 = vadd.xlane.f32.xlu1 %v301_v31 }
 0x303   :  { %384 = vrot.lane.b32.xlu1 %v512_v9, %s637_s6 }
 0x37b   :  { %v300_v32 = vpop.xlane.xlu0 %299 }
 0x37c   :  { %554 = vrcp.f32 %v300_v32 }
 0x37f   :  { %v303_v33 = vpop.xlane.xlu1 %302 }
 0x380   :  { %556 = vrcp.f32 %v303_v33 }
 0x383   :  { %v385_v34 = vpop.permute.xlu1 %384 }
 0x384   :  { %529 = vmatpush3.msra.mxu1 %v385_v34 }
 0x386   :  { %v555_v35 = vpop.eup %554 }
 0x387   :  { %v306_v36 = vmul.f32 %v555_v35, %v551_v28 }
 0x389   :  { %526 = vmatmul.mubr.msk.f32.vlgmr.msra.gmra.mrb[2].mxu0 %vm285_vm3, %v306_v36 }
 0x38a   :  { %v557_v37 = vpop.eup %556 }
 0x38b   :  { %v307_v38 = vmul.f32 %v557_v37, %v553_v30 }
 0x38d   :  { %531 = vmatmul.mubr.msk.f32.vlgmr.msra.gmra.mrb[4].mxu1 %vm285_vm3, %v307_v38 }
 0x45c   :  { %v380_v39 = vpop.f32.mrb[2].mxu0 }
 0x45d   :  { %460 = vst.msk [vmem:[#allocation7] sm:$0xff] %vm131_vm2, %v380_v39  ;;  %v527_v40 = vpop.f32.mrb[3].mxu0 }
 0x460   :  { %v456_v41 = vpop.f32.mrb[4].mxu1 }
 0x461   :  { %461 = vst.msk [vmem:[#allocation7 + $0x8] sm:$0xff] %vm131_vm2, %v456_v41  ;;  %v532_v42 = vpop.f32.mrb[5].mxu1 }
 0x462   :  { %613 = shalt.err (!%p610_p6)
}
 0x463   :  { %s614_s12 = scalar_lea.hbm %s717_s2, 256 }
 0x464   :  { %p615_p7 = scmp.ne.s32.totalorder %s717_s2, %s614_s12  ;;  %p618_p8 = scmp.lt.u32.totalorder %s614_s12, %s717_s2 }
 0x466   :  { %p620_p9 = pnand %p618_p8, %p615_p7 }
 0x468   :  { %623 = shalt.err (!%p620_p9)
}
 0x469   :  { %473 = dma.vmem_to_hbm [thread:$0]  %s468_s8, 256, %s717_s2, [#allocation4], %s631_s19, %s631_s19, %s632_s20  }
 0x46a   :  { %628 = dma.done.wait [#allocation4], 256  }
 0x46b   :  { %629 = vsyncadd [#allocation4], 4294967040 }
 0x46c   :  { %477 = vsyncpa [#allocation3], 1 }
 0x46d   :  { %478 = vsyncpa [#allocation6], 1 }
 0x46e   :  { %479 = vsyncpa [#allocation4], 1 }

</bundles_post_ra>
